<compile_context>
chip_gen: v7x
topology: tpu7x:2x2x1
jax: 0.10.0
libtpu: 0.0.40
codegen_flags: <defaults>
</compile_context>

<pallas_src>
import functools

import jax
import jax.numpy as jnp
from jax.experimental import pallas as pl
from jax.experimental.pallas import tpu as pltpu


def _layernorm(y, gamma, beta, eps=1e-5):
    mu = jnp.mean(y, axis=-1, keepdims=True)
    var = jnp.mean((y - mu) ** 2, axis=-1, keepdims=True)
    return (y - mu) * jax.lax.rsqrt(var + eps) * gamma + beta


def stacked_block_kernel(
    bias_ref,   # (Rt, Rt)       f32   additive attention bias (0 / -1e30), grid-constant
    x_ref,      # (Rt, emb)      f32   input rows for this tile
    wqkv_ref,   # (emb, 3*h*d)   bf16  [Wq/d | Wk | Wv] fused slab
    wo_ref,     # (h*d, emb)     bf16
    bo_ref,     # (1, emb)       f32
    ln1g_ref,   # (1, emb)       f32
    ln1b_ref,   # (1, emb)       f32
    w1_ref,     # (emb, ff)      bf16
    b1_ref,     # (1, ff)        f32
    w2_ref,     # (ff, emb)      bf16
    b2_ref,     # (1, emb)       f32
    ln2g_ref,   # (1, emb)       f32
    ln2b_ref,   # (1, emb)       f32
    o_ref,      # (Rt, emb)      f32   output rows for this tile
    act_ref,    # (Rt, emb)      f32   VMEM scratch: activation carried over depth
    *,
    heads,
    hidden,
):
    layer = pl.program_id(1)
    depth = pl.num_programs(1)
    h, d = heads, hidden
    hd = h * d
    bf16 = jnp.bfloat16
    f32 = jnp.float32

    # First layer for this row tile: load activations from the HBM input block.
    @pl.when(layer == 0)
    def _():
        act_ref[...] = x_ref[...]

    x = act_ref[...]                                      # (Rt, emb) f32
    rt, emb = x.shape
    xb = x.astype(bf16)

    # Fused QKV projection: one well-shaped MXU matmul (N = 3*h*d, K = emb).
    # 1/d score scale is already folded into Wq by the wrapper.
    qkv = jnp.dot(xb, wqkv_ref[...],
                  preferred_element_type=f32)             # (Rt, 3*h*d) f32
    qkv_b = qkv.astype(bf16)

    bias = bias_ref[...]                                  # (Rt, Rt) f32, precomputed

    # Per-head attention on static lane slices of the fused QKV slab.
    # TODO(synk): only att_type='all' masking (dropout=0) is implemented; the
    #             'local'/'strided' variants of parrallel_recomb are not.
    # TODO(synk): for d not a multiple of 128, pad the head dim in the wrapper to
    #             keep the per-head lane slices tile-aligned on large models.
    ctx_parts = []
    for i in range(h):
        qi = qkv_b[:, i * d:(i + 1) * d]                  # (Rt, d) bf16
        ki = qkv_b[:, hd + i * d: hd + (i + 1) * d]       # (Rt, d) bf16
        vi = qkv_b[:, 2 * hd + i * d: 2 * hd + (i + 1) * d]

        s = jax.lax.dot_general(qi, ki, (((1,), (1,)), ((), ())),
                                preferred_element_type=f32)      # (Rt, Rt)
        s = s + bias
        m = jnp.max(s, axis=-1, keepdims=True)            # diag unmasked -> finite
        p = jnp.exp(s - m)
        denom = jnp.sum(p, axis=-1, keepdims=True)
        p = p * pl.reciprocal(denom, approx=True)         # EUP slot, frees the VPU
        ctx_parts.append(jnp.dot(p.astype(bf16), vi,
                                 preferred_element_type=f32))    # (Rt, d) f32

    ctx = jnp.concatenate(ctx_parts, axis=-1)             # (Rt, h*d) f32

    # Single output projection over all heads (K = h*d) + bias.
    attended = jnp.dot(ctx.astype(bf16), wo_ref[...],
                       preferred_element_type=f32) + bo_ref[...]   # (Rt, emb)

    # Residual + LayerNorm 1 (f32).
    y = _layernorm(attended + x, ln1g_ref[...], ln1b_ref[...])

    # Feed-forward: Linear -> ReLU -> Linear (bf16 MXU operands, f32 accumulate).
    hmid = jnp.dot(y.astype(bf16), w1_ref[...],
                   preferred_element_type=f32) + b1_ref[...]
    hmid = jnp.maximum(hmid, 0.0)
    ffo = jnp.dot(hmid.astype(bf16), w2_ref[...],
                  preferred_element_type=f32) + b2_ref[...]

    # Residual + LayerNorm 2 (f32).
    z = _layernorm(ffo + y, ln2g_ref[...], ln2b_ref[...])

    act_ref[...] = z                                      # carry to next layer

    # Only the last layer's activations go back to HBM (lane-dense slab).
    @pl.when(layer == depth - 1)
    def _():
        o_ref[...] = z.astype(o_ref.dtype)


def _pick_samples_per_tile(bs, n, requested=None):
    """Rows-per-tile heuristic (review items: bigger tiles for short seq,
    1 sample/tile for long seq, >=2 tiles so both v7x TensorCores work)."""
    if requested is not None:
        want = max(1, min(bs, requested))
    elif n >= 128:
        want = 1                                  # avoid masked cross-sample score work
    else:
        want = max(1, min(bs, 512 // max(n, 1)))  # amortize per-tile weight streaming
        want = min(want, max(1, 1024 // max(n, 1)))   # bound rt^2 score buffers
        if bs >= 2:
            want = min(want, max(1, bs // 2))     # keep >=2 row tiles (v7x megacore)
    # Respect the (8, 128) sublane constraint on the row-tile block.
    for s in range(min(want, bs), 0, -1):
        if bs % s == 0 and ((s * n) % 8 == 0 or bs // s == 1):
            return s
    return bs                                     # single full-array tile (always legal)


def stacked_transformer_blocks(x, all_params, *, heads, hidden,
                               samples_per_tile=None):
    bs, n, emb = x.shape
    depth = len(all_params)
    h, d = heads, hidden
    hd = h * d
    ff = all_params[0]["w1"].shape[1]
    bf16 = jnp.bfloat16

    spt = _pick_samples_per_tile(bs, n, samples_per_tile)
    rt = spt * n
    bs_tiles = bs // spt

    x2d = x.reshape(bs * n, emb)

    # Precompute the block-diagonal causal mask once as an additive f32 bias.
    row = jnp.arange(rt)
    same_sample = (row[:, None] // n) == (row[None, :] // n)
    causal = row[:, None] >= row[None, :]
    attn_bias = jnp.where(same_sample & causal, 0.0, -1e30).astype(jnp.float32)

    def stack(name):
        return jnp.stack([p[name] for p in all_params], axis=0)

    # Fused QKV slab; fold the full 1/d score scale into Wq before the bf16 cast.
    wq_scaled = stack("wq") * (1.0 / d)
    wqkv = jnp.concatenate([wq_scaled, stack("wk"), stack("wv")],
                           axis=-1).astype(bf16)            # (depth, emb, 3*h*d)
    wo = stack("wo").astype(bf16)                            # (depth, h*d, emb)
    bo = stack("bo")
    ln1g, ln1b = stack("ln1_g"), stack("ln1_b")
    w1, b1 = stack("w1").astype(bf16), stack("b1")
    w2, b2 = stack("w2").astype(bf16), stack("b2")
    ln2g, ln2b = stack("ln2_g"), stack("ln2_b")

    weights = (wqkv, wo, bo, ln1g, ln1b, w1, b1, w2, b2, ln2g, ln2b)
    weight_bytes = sum(int(w.size) * jnp.dtype(w.dtype).itemsize for w in weights)
    per_layer_bytes = weight_bytes // depth

    def per_layer_spec(*dims):
        nd = len(dims)
        # Leading depth dim indexed by the depth grid axis and squeezed away;
        # depth-varying blocks are double-buffered -> layer l+1's weights are
        # prefetched while layer l computes.
        return pl.BlockSpec((None,) + dims,
                            lambda i, l, _n=nd: (l,) + (0,) * _n)

    in_specs = [
        pl.BlockSpec((rt, rt), lambda i, l: (0, 0)),    # attn bias (grid-constant)
        pl.BlockSpec((rt, emb), lambda i, l: (i, 0)),   # x rows (constant over l)
        per_layer_spec(emb, 3 * hd),                    # fused Wqkv
        per_layer_spec(hd, emb),                        # wo
        per_layer_spec(1, emb),                         # bo
        per_layer_spec(1, emb),                         # ln1 gamma
        per_layer_spec(1, emb),                         # ln1 beta
        per_layer_spec(emb, ff),                        # w1
        per_layer_spec(1, ff),                          # b1
        per_layer_spec(ff, emb),                        # w2
        per_layer_spec(1, emb),                         # b2
        per_layer_spec(1, emb),                         # ln2 gamma
        per_layer_spec(1, emb),                         # ln2 beta
    ]

    flops_layer_tile = (
        2 * rt * emb * 3 * hd           # fused qkv projection
        + 2 * 2 * h * rt * rt * d       # scores + attn @ V (incl. masked blocks)
        + 2 * rt * hd * emb             # output projection
        + 2 * 2 * rt * emb * ff         # feed-forward
    )
    cost = pl.CostEstimate(
        flops=int(bs_tiles * depth * flops_layer_tile),
        transcendentals=int(bs_tiles * depth * (h * rt * rt + h * rt + 4 * rt)),
        # Per-layer weights are re-streamed from HBM for every row tile.
        bytes_accessed=int(bs_tiles * weight_bytes + 2 * bs * n * emb * 4 + rt * rt * 4),
    )

    # Real VMEM requirement: double-buffered layer weights + in/out activation
    # blocks + scratch + live intermediates, clamped to the chip's capacity.
    act_block = rt * emb * 4
    need = (2 * per_layer_bytes
            + 4 * act_block                 # double-buffered x in + out blocks
            + act_block                     # activation scratch
            + 3 * rt * rt * 4               # attn bias + live score buffers
            + rt * (3 * hd) * 6             # qkv (f32 + bf16 copy)
            + rt * ff * 4                   # hmid
            + rt * (hd + emb) * 4           # ctx + attended
            + (8 << 20))                    # relayout / scheduling margin
    try:
        vmem_cap = int(pltpu.get_tpu_info().vmem_capacity_bytes)
    except Exception:
        vmem_cap = 64 * (1 << 20)           # conservative: v7x per-TC capacity
    vmem_limit = int(min(max(need, 32 * (1 << 20)), vmem_cap - (8 << 20)))
    # TODO(synk): if 2*per_layer_bytes ever exceeds the budget (huge ff on v7x),
    #             chunk w1/w2 over an inner ff grid axis instead of shrinking rt.

    kernel = functools.partial(stacked_block_kernel, heads=heads, hidden=hidden)

    out2d = pl.pallas_call(
        kernel,
        out_shape=jax.ShapeDtypeStruct((bs * n, emb), x.dtype),
        grid=(bs_tiles, depth),
        in_specs=in_specs,
        out_specs=pl.BlockSpec((rt, emb), lambda i, l: (i, 0)),
        scratch_shapes=[pltpu.VMEM((rt, emb), jnp.float32)],
        compiler_params=pltpu.CompilerParams(
            dimension_semantics=("parallel", "arbitrary"),
            vmem_limit_bytes=vmem_limit),
        cost_estimate=cost,
    )(attn_bias, x2d, wqkv, wo, bo, ln1g, ln1b, w1, b1, w2, b2, ln2g, ln2b)

    return out2d.reshape(bs, n, emb)


# ---------------- pure-JAX references (for sanity checks) ----------------

def _ln(y, g, b):
    mu = jnp.mean(y, axis=-1, keepdims=True)
    var = jnp.mean((y - mu) ** 2, axis=-1, keepdims=True)
    return (y - mu) * jax.lax.rsqrt(var + 1e-5) * g + b


def _ref_block_f32(x, p, heads, hidden):
    bs, n, emb = x.shape
    d = hidden
    q = (x @ p["wq"]).reshape(bs, n, heads, d).transpose(0, 2, 1, 3) / jnp.sqrt(d)
    k = (x @ p["wk"]).reshape(bs, n, heads, d).transpose(0, 2, 1, 3) / jnp.sqrt(d)
    v = (x @ p["wv"]).reshape(bs, n, heads, d).transpose(0, 2, 1, 3)
    dot = jnp.einsum("bhqd,bhkd->bhqk", q, k)
    mask = jnp.arange(n)[:, None] >= jnp.arange(n)[None, :]
    dot = jnp.where(mask, dot, -jnp.inf)
    dot = jax.nn.softmax(dot, axis=-1)
    out = jnp.einsum("bhqk,bhkd->bhqd", dot, v)
    out = out.transpose(0, 2, 1, 3).reshape(bs, n, heads * d)
    attended = out @ p["wo"] + p["bo"]
    y = _ln(attended + x, p["ln1_g"], p["ln1_b"])
    ffw = jnp.maximum(y @ p["w1"] + p["b1"], 0.0) @ p["w2"] + p["b2"]
    return _ln(ffw + y, p["ln2_g"], p["ln2_b"])


def _ref_block_mixed(x, p, heads, hidden):
    """Same math with the kernel's mixed-precision policy (bf16 MXU operands,
    1/d folded into Wq before the bf16 cast)."""
    bs, n, emb = x.shape
    h, d = heads, hidden
    bf16, f32 = jnp.bfloat16, jnp.float32
    xb = x.astype(bf16).reshape(bs * n, emb)
    wq = (p["wq"] * (1.0 / d)).astype(bf16)
    q = jnp.dot(xb, wq, preferred_element_type=f32)
    k = jnp.dot(xb, p["wk"].astype(bf16), preferred_element_type=f32)
    v = jnp.dot(xb, p["wv"].astype(bf16), preferred_element_type=f32)
    q = q.reshape(bs, n, h, d).transpose(0, 2, 1, 3)
    k = k.reshape(bs, n, h, d).transpose(0, 2, 1, 3)
    v = v.reshape(bs, n, h, d).transpose(0, 2, 1, 3)
    dot = jnp.einsum("bhqd,bhkd->bhqk", q.astype(bf16), k.astype(bf16),
                     preferred_element_type=f32)
    mask = jnp.arange(n)[:, None] >= jnp.arange(n)[None, :]
    dot = jnp.where(mask, dot, -jnp.inf)
    dot = jax.nn.softmax(dot, axis=-1)
    ctx = jnp.einsum("bhqk,bhkd->bhqd", dot.astype(bf16), v.astype(bf16),
                     preferred_element_type=f32)
    ctx = ctx.transpose(0, 2, 1, 3).reshape(bs * n, h * d)
    attended = (jnp.dot(ctx.astype(bf16), p["wo"].astype(bf16),
                        preferred_element_type=f32) + p["bo"]).reshape(bs, n, emb)
    y = _ln(attended + x, p["ln1_g"], p["ln1_b"])
    y2 = y.reshape(bs * n, emb)
    hmid = jnp.maximum(jnp.dot(y2.astype(bf16), p["w1"].astype(bf16),
                               preferred_element_type=f32) + p["b1"], 0.0)
    ffo = (jnp.dot(hmid.astype(bf16), p["w2"].astype(bf16),
                   preferred_element_type=f32) + p["b2"]).reshape(bs, n, emb)
    return _ln(ffo + y, p["ln2_g"], p["ln2_b"])


def _ref_stack(x, all_params, heads, hidden, block_fn):
    for p in all_params:
        x = block_fn(x, p, heads, hidden)
    return x


# ---------------- deterministic parameter init ----------------

def init_block_params(key, emb, hidden, heads, ff_mult):
    hd = hidden * heads
    ff = ff_mult * emb
    ks = jax.random.split(key, 8)

    def lin(k, fan_in, fan_out):
        return (jax.random.normal(k, (fan_in, fan_out), jnp.float32)
                / jnp.sqrt(jnp.float32(fan_in)))

    return {
        "wq": lin(ks[0], emb, hd),
        "wk": lin(ks[1], emb, hd),
        "wv": lin(ks[2], emb, hd),
        "wo": lin(ks[3], hd, emb),
        "bo": jax.random.normal(ks[4], (1, emb), jnp.float32) * 0.02,
        "w1": lin(ks[5], emb, ff),
        "b1": jax.random.normal(ks[6], (1, ff), jnp.float32) * 0.02,
        "w2": lin(ks[7], ff, emb),
        "b2": jnp.zeros((1, emb), jnp.float32),
        "ln1_g": jnp.ones((1, emb), jnp.float32),
        "ln1_b": jnp.zeros((1, emb), jnp.float32),
        "ln2_g": jnp.ones((1, emb), jnp.float32),
        "ln2_b": jnp.zeros((1, emb), jnp.float32),
    }


if __name__ == "__main__":
    # Small shapes consistent with the module's forward: (batch, seq, emb).
    bs, n, emb = 2, 8, 32
    hidden, heads, ff_mult, depth = 16, 4, 2, 2

    key = jax.random.PRNGKey(0)
    kx, kp = jax.random.split(key)
    x = jax.random.normal(kx, (bs, n, emb), jnp.float32)

    param_keys = jax.random.split(kp, depth)
    all_params = [init_block_params(param_keys[i], emb, hidden, heads, ff_mult)
                  for i in range(depth)]

    out = stacked_transformer_blocks(x, all_params, heads=heads, hidden=hidden)
    out = jax.block_until_ready(out)
    assert out.shape == (bs, n, emb)

    # Primary check: matched mixed-precision (bf16 MXU operands) JAX reference.
    ref_mixed = _ref_stack(x, all_params, heads, hidden, _ref_block_mixed)
    assert jnp.allclose(out, ref_mixed, atol=2e-2, rtol=2e-2), \
        "mismatch vs matched-precision JAX reference"

    # Secondary check: gross-drift bound vs a pure float32 reference.
    ref_f32 = _ref_stack(x, all_params, heads, hidden, _ref_block_f32)
    assert float(jnp.max(jnp.abs(out - ref_f32))) < 0.3, \
        "excessive drift vs float32 reference"

    print("KERNEL_OK")
</pallas_src>

<mosaic_0001>
module attributes {stable_mosaic.version = 11 : i64} {
  func.func @stacked_block_kernel(%arg0: i32, %arg1: i32, %arg2: memref<8x8xf32, #tpu.memory_space<vmem>>, %arg3: memref<8x32xf32, #tpu.memory_space<vmem>>, %arg4: memref<1x32x192xbf16, #tpu.memory_space<vmem>>, %arg5: memref<1x64x32xbf16, #tpu.memory_space<vmem>>, %arg6: memref<1x1x32xf32, #tpu.memory_space<vmem>>, %arg7: memref<1x1x32xf32, #tpu.memory_space<vmem>>, %arg8: memref<1x1x32xf32, #tpu.memory_space<vmem>>, %arg9: memref<1x32x64xbf16, #tpu.memory_space<vmem>>, %arg10: memref<1x1x64xf32, #tpu.memory_space<vmem>>, %arg11: memref<1x64x32xbf16, #tpu.memory_space<vmem>>, %arg12: memref<1x1x32xf32, #tpu.memory_space<vmem>>, %arg13: memref<1x1x32xf32, #tpu.memory_space<vmem>>, %arg14: memref<1x1x32xf32, #tpu.memory_space<vmem>>, %arg15: memref<8x32xf32, #tpu.memory_space<vmem>>, %arg16: memref<8x32xf32, #tpu.memory_space<vmem>>) attributes {dimension_semantics = [#tpu.dimension_semantics<parallel>, #tpu.dimension_semantics<arbitrary>], iteration_bounds = array<i64: 2, 2>, scalar_prefetch = 0 : i64, scratch_operands = 1 : i64, tpu.core_type = #tpu.core_type<tc>, window_params = [{pipeline_mode = #tpu.pipeline_mode<synchronous>, transform_indices = @transform_0, window_bounds = array<i64: 8, 8>}, {transform_indices = @transform_1, window_bounds = array<i64: 8, 32>}, {transform_indices = @transform_2, window_bounds = array<i64: 1, 32, 192>}, {transform_indices = @transform_3, window_bounds = array<i64: 1, 64, 32>}, {transform_indices = @transform_4, window_bounds = array<i64: 1, 1, 32>}, {transform_indices = @transform_5, window_bounds = array<i64: 1, 1, 32>}, {transform_indices = @transform_6, window_bounds = array<i64: 1, 1, 32>}, {transform_indices = @transform_7, window_bounds = array<i64: 1, 32, 64>}, {transform_indices = @transform_8, window_bounds = array<i64: 1, 1, 64>}, {transform_indices = @transform_9, window_bounds = array<i64: 1, 64, 32>}, {transform_indices = @transform_10, window_bounds = array<i64: 1, 1, 32>}, {transform_indices = @transform_11, window_bounds = array<i64: 1, 1, 32>}, {transform_indices = @transform_12, window_bounds = array<i64: 1, 1, 32>}, {transform_indices = @transform_13, window_bounds = array<i64: 8, 32>}]} {
    %c0_i32 = arith.constant 0 : i32
    %0 = arith.cmpi eq, %arg1, %c0_i32 : i32
    %1 = arith.extui %0 : i1 to i32
    %c0_i32_0 = arith.constant 0 : i32
    %2 = arith.cmpi ne, %1, %c0_i32_0 : i32
    scf.if %2 {
      %c0_70 = arith.constant 0 : index
      %c0_71 = arith.constant 0 : index
      %163 = vector.load %arg3[%c0_70, %c0_71] : memref<8x32xf32, #tpu.memory_space<vmem>>, vector<8x32xf32>
      %c0_72 = arith.constant 0 : index
      %c0_73 = arith.constant 0 : index
      %164 = vector.load %arg16[%c0_72, %c0_73] : memref<8x32xf32, #tpu.memory_space<vmem>>, vector<8x32xf32>
      tpu.vector_store %arg16[%c0_72, %c0_73], %163 {strides = array<i32>} : memref<8x32xf32, #tpu.memory_space<vmem>>, vector<8x32xf32>,
    } else {
    }
    %c0 = arith.constant 0 : index
    %c0_1 = arith.constant 0 : index
    %3 = vector.load %arg16[%c0, %c0_1] : memref<8x32xf32, #tpu.memory_space<vmem>>, vector<8x32xf32>
    %4 = arith.truncf %3 : vector<8x32xf32> to vector<8x32xbf16>
    %c0_2 = arith.constant 0 : index
    %c0_3 = arith.constant 0 : index
    %c0_4 = arith.constant 0 : index
    %5 = vector.load %arg4[%c0_2, %c0_3, %c0_4] : memref<1x32x192xbf16, #tpu.memory_space<vmem>>, vector<1x32x192xbf16>
    %6 = vector.shape_cast %5 : vector<1x32x192xbf16> to vector<32x192xbf16>
    %cst = arith.constant dense<0.000000e+00> : vector<8x192xf32>
    %7 = tpu.matmul %4, %6, %cst {dimension_numbers = #tpu.dot_dimension_numbers<[1], [0], [0], [1], [0, 0, 1, 1], [], []>} : vector<8x32xbf16>, vector<32x192xbf16>, vector<8x192xf32> -> vector<8x192xf32>
    %8 = arith.truncf %7 : vector<8x192xf32> to vector<8x192xbf16>
    %c0_5 = arith.constant 0 : index
    %c0_6 = arith.constant 0 : index
    %9 = vector.load %arg2[%c0_5, %c0_6] : memref<8x8xf32, #tpu.memory_space<vmem>>, vector<8x8xf32>
    %10 = vector.extract_strided_slice %8 {offsets = [0, 0], sizes = [8, 16], strides = [1, 1]} : vector<8x192xbf16> to vector<8x16xbf16>
    %11 = vector.extract_strided_slice %8 {offsets = [0, 64], sizes = [8, 16], strides = [1, 1]} : vector<8x192xbf16> to vector<8x16xbf16>
    %12 = vector.extract_strided_slice %8 {offsets = [0, 128], sizes = [8, 16], strides = [1, 1]} : vector<8x192xbf16> to vector<8x16xbf16>
    %cst_7 = arith.constant dense<0.000000e+00> : vector<8x8xf32>
    %13 = tpu.matmul %10, %11, %cst_7 {dimension_numbers = #tpu.dot_dimension_numbers<[1], [1], [0], [0], [0, 0, 1, 0], [], []>} : vector<8x16xbf16>, vector<8x16xbf16>, vector<8x8xf32> -> vector<8x8xf32>
    %14 = arith.addf %13, %9 : vector<8x8xf32>
    %cst_8 = arith.constant dense<0xFF800000> : vector<8xf32>
    %15 = vector.multi_reduction <maximumf>, %14, %cst_8 [1] : vector<8x8xf32> to vector<8xf32>
    %16 = vector.shape_cast %15 : vector<8xf32> to vector<8x1xf32>
    %17 = vector.broadcast %16 : vector<8x1xf32> to vector<8x8xf32>
    %18 = arith.subf %14, %17 : vector<8x8xf32>
    %19 = math.exp %18 : vector<8x8xf32>
    %cst_9 = arith.constant dense<0.000000e+00> : vector<8xf32>
    %20 = vector.multi_reduction <add>, %19, %cst_9 [1] : vector<8x8xf32> to vector<8xf32>
    %21 = vector.shape_cast %20 : vector<8xf32> to vector<8x1xf32>
    %22 = tpu.reciprocal %21 {approx = true} : vector<8x1xf32> -> vector<8x1xf32>
    %23 = vector.broadcast %22 : vector<8x1xf32> to vector<8x8xf32>
    %24 = arith.mulf %19, %23 : vector<8x8xf32>
    %25 = arith.truncf %24 : vector<8x8xf32> to vector<8x8xbf16>
    %cst_10 = arith.constant dense<0.000000e+00> : vector<8x16xf32>
    %26 = tpu.matmul %25, %12, %cst_10 {dimension_numbers = #tpu.dot_dimension_numbers<[1], [0], [0], [1], [0, 0, 1, 1], [], []>} : vector<8x8xbf16>, vector<8x16xbf16>, vector<8x16xf32> -> vector<8x16xf32>
    %27 = vector.extract_strided_slice %8 {offsets = [0, 16], sizes = [8, 16], strides = [1, 1]} : vector<8x192xbf16> to vector<8x16xbf16>
    %28 = vector.extract_strided_slice %8 {offsets = [0, 80], sizes = [8, 16], strides = [1, 1]} : vector<8x192xbf16> to vector<8x16xbf16>
    %29 = vector.extract_strided_slice %8 {offsets = [0, 144], sizes = [8, 16], strides = [1, 1]} : vector<8x192xbf16> to vector<8x16xbf16>
    %cst_11 = arith.constant dense<0.000000e+00> : vector<8x8xf32>
    %30 = tpu.matmul %27, %28, %cst_11 {dimension_numbers = #tpu.dot_dimension_numbers<[1], [1], [0], [0], [0, 0, 1, 0], [], []>} : vector<8x16xbf16>, vector<8x16xbf16>, vector<8x8xf32> -> vector<8x8xf32>
    %31 = arith.addf %30, %9 : vector<8x8xf32>
    %cst_12 = arith.constant dense<0xFF800000> : vector<8xf32>
    %32 = vector.multi_reduction <maximumf>, %31, %cst_12 [1] : vector<8x8xf32> to vector<8xf32>
    %33 = vector.shape_cast %32 : vector<8xf32> to vector<8x1xf32>
    %34 = vector.broadcast %33 : vector<8x1xf32> to vector<8x8xf32>
    %35 = arith.subf %31, %34 : vector<8x8xf32>
    %36 = math.exp %35 : vector<8x8xf32>
    %cst_13 = arith.constant dense<0.000000e+00> : vector<8xf32>
    %37 = vector.multi_reduction <add>, %36, %cst_13 [1] : vector<8x8xf32> to vector<8xf32>
    %38 = vector.shape_cast %37 : vector<8xf32> to vector<8x1xf32>
    %39 = tpu.reciprocal %38 {approx = true} : vector<8x1xf32> -> vector<8x1xf32>
    %40 = vector.broadcast %39 : vector<8x1xf32> to vector<8x8xf32>
    %41 = arith.mulf %36, %40 : vector<8x8xf32>
    %42 = arith.truncf %41 : vector<8x8xf32> to vector<8x8xbf16>
    %cst_14 = arith.constant dense<0.000000e+00> : vector<8x16xf32>
    %43 = tpu.matmul %42, %29, %cst_14 {dimension_numbers = #tpu.dot_dimension_numbers<[1], [0], [0], [1], [0, 0, 1, 1], [], []>} : vector<8x8xbf16>, vector<8x16xbf16>, vector<8x16xf32> -> vector<8x16xf32>
    %44 = vector.extract_strided_slice %8 {offsets = [0, 32], sizes = [8, 16], strides = [1, 1]} : vector<8x192xbf16> to vector<8x16xbf16>
    %45 = vector.extract_strided_slice %8 {offsets = [0, 96], sizes = [8, 16], strides = [1, 1]} : vector<8x192xbf16> to vector<8x16xbf16>
    %46 = vector.extract_strided_slice %8 {offsets = [0, 160], sizes = [8, 16], strides = [1, 1]} : vector<8x192xbf16> to vector<8x16xbf16>
    %cst_15 = arith.constant dense<0.000000e+00> : vector<8x8xf32>
    %47 = tpu.matmul %44, %45, %cst_15 {dimension_numbers = #tpu.dot_dimension_numbers<[1], [1], [0], [0], [0, 0, 1, 0], [], []>} : vector<8x16xbf16>, vector<8x16xbf16>, vector<8x8xf32> -> vector<8x8xf32>
    %48 = arith.addf %47, %9 : vector<8x8xf32>
    %cst_16 = arith.constant dense<0xFF800000> : vector<8xf32>
    %49 = vector.multi_reduction <maximumf>, %48, %cst_16 [1] : vector<8x8xf32> to vector<8xf32>
    %50 = vector.shape_cast %49 : vector<8xf32> to vector<8x1xf32>
    %51 = vector.broadcast %50 : vector<8x1xf32> to vector<8x8xf32>
    %52 = arith.subf %48, %51 : vector<8x8xf32>
    %53 = math.exp %52 : vector<8x8xf32>
    %cst_17 = arith.constant dense<0.000000e+00> : vector<8xf32>
    %54 = vector.multi_reduction <add>, %53, %cst_17 [1] : vector<8x8xf32> to vector<8xf32>
    %55 = vector.shape_cast %54 : vector<8xf32> to vector<8x1xf32>
    %56 = tpu.reciprocal %55 {approx = true} : vector<8x1xf32> -> vector<8x1xf32>
    %57 = vector.broadcast %56 : vector<8x1xf32> to vector<8x8xf32>
    %58 = arith.mulf %53, %57 : vector<8x8xf32>
    %59 = arith.truncf %58 : vector<8x8xf32> to vector<8x8xbf16>
    %cst_18 = arith.constant dense<0.000000e+00> : vector<8x16xf32>
    %60 = tpu.matmul %59, %46, %cst_18 {dimension_numbers = #tpu.dot_dimension_numbers<[1], [0], [0], [1], [0, 0, 1, 1], [], []>} : vector<8x8xbf16>, vector<8x16xbf16>, vector<8x16xf32> -> vector<8x16xf32>
    %61 = vector.extract_strided_slice %8 {offsets = [0, 48], sizes = [8, 16], strides = [1, 1]} : vector<8x192xbf16> to vector<8x16xbf16>
    %62 = vector.extract_strided_slice %8 {offsets = [0, 112], sizes = [8, 16], strides = [1, 1]} : vector<8x192xbf16> to vector<8x16xbf16>
    %63 = vector.extract_strided_slice %8 {offsets = [0, 176], sizes = [8, 16], strides = [1, 1]} : vector<8x192xbf16> to vector<8x16xbf16>
    %cst_19 = arith.constant dense<0.000000e+00> : vector<8x8xf32>
    %64 = tpu.matmul %61, %62, %cst_19 {dimension_numbers = #tpu.dot_dimension_numbers<[1], [1], [0], [0], [0, 0, 1, 0], [], []>} : vector<8x16xbf16>, vector<8x16xbf16>, vector<8x8xf32> -> vector<8x8xf32>
    %65 = arith.addf %64, %9 : vector<8x8xf32>
    %cst_20 = arith.constant dense<0xFF800000> : vector<8xf32>
    %66 = vector.multi_reduction <maximumf>, %65, %cst_20 [1] : vector<8x8xf32> to vector<8xf32>
    %67 = vector.shape_cast %66 : vector<8xf32> to vector<8x1xf32>
    %68 = vector.broadcast %67 : vector<8x1xf32> to vector<8x8xf32>
    %69 = arith.subf %65, %68 : vector<8x8xf32>
    %70 = math.exp %69 : vector<8x8xf32>
    %cst_21 = arith.constant dense<0.000000e+00> : vector<8xf32>
    %71 = vector.multi_reduction <add>, %70, %cst_21 [1] : vector<8x8xf32> to vector<8xf32>
    %72 = vector.shape_cast %71 : vector<8xf32> to vector<8x1xf32>
    %73 = tpu.reciprocal %72 {approx = true} : vector<8x1xf32> -> vector<8x1xf32>
    %74 = vector.broadcast %73 : vector<8x1xf32> to vector<8x8xf32>
    %75 = arith.mulf %70, %74 : vector<8x8xf32>
    %76 = arith.truncf %75 : vector<8x8xf32> to vector<8x8xbf16>
    %cst_22 = arith.constant dense<0.000000e+00> : vector<8x16xf32>
    %77 = tpu.matmul %76, %63, %cst_22 {dimension_numbers = #tpu.dot_dimension_numbers<[1], [0], [0], [1], [0, 0, 1, 1], [], []>} : vector<8x8xbf16>, vector<8x16xbf16>, vector<8x16xf32> -> vector<8x16xf32>
    %78 = tpu.concatenate %26, %43, %60, %77 in 1 : vector<8x16xf32>, vector<8x16xf32>, vector<8x16xf32>, vector<8x16xf32> -> vector<8x64xf32>
    %79 = arith.truncf %78 : vector<8x64xf32> to vector<8x64xbf16>
    %c0_23 = arith.constant 0 : index
    %c0_24 = arith.constant 0 : index
    %c0_25 = arith.constant 0 : index
    %80 = vector.load %arg5[%c0_23, %c0_24, %c0_25] : memref<1x64x32xbf16, #tpu.memory_space<vmem>>, vector<1x64x32xbf16>
    %81 = vector.shape_cast %80 : vector<1x64x32xbf16> to vector<64x32xbf16>
    %cst_26 = arith.constant dense<0.000000e+00> : vector<8x32xf32>
    %82 = tpu.matmul %79, %81, %cst_26 {dimension_numbers = #tpu.dot_dimension_numbers<[1], [0], [0], [1], [0, 0, 1, 1], [], []>} : vector<8x64xbf16>, vector<64x32xbf16>, vector<8x32xf32> -> vector<8x32xf32>
    %c0_27 = arith.constant 0 : index
    %c0_28 = arith.constant 0 : index
    %c0_29 = arith.constant 0 : index
    %83 = vector.load %arg6[%c0_27, %c0_28, %c0_29] : memref<1x1x32xf32, #tpu.memory_space<vmem>>, vector<1x1x32xf32>
    %84 = vector.shape_cast %83 : vector<1x1x32xf32> to vector<1x32xf32>
    %85 = vector.broadcast %84 : vector<1x32xf32> to vector<8x32xf32>
    %86 = arith.addf %82, %85 : vector<8x32xf32>
    %87 = arith.addf %86, %3 : vector<8x32xf32>
    %c0_30 = arith.constant 0 : index
    %c0_31 = arith.constant 0 : index
    %c0_32 = arith.constant 0 : index
    %88 = vector.load %arg7[%c0_30, %c0_31, %c0_32] : memref<1x1x32xf32, #tpu.memory_space<vmem>>, vector<1x1x32xf32>
    %89 = vector.shape_cast %88 : vector<1x1x32xf32> to vector<1x32xf32>
    %c0_33 = arith.constant 0 : index
    %c0_34 = arith.constant 0 : index
    %c0_35 = arith.constant 0 : index
    %90 = vector.load %arg8[%c0_33, %c0_34, %c0_35] : memref<1x1x32xf32, #tpu.memory_space<vmem>>, vector<1x1x32xf32>
    %91 = vector.shape_cast %90 : vector<1x1x32xf32> to vector<1x32xf32>
    %cst_36 = arith.constant dense<0.000000e+00> : vector<8xf32>
    %92 = vector.multi_reduction <add>, %87, %cst_36 [1] : vector<8x32xf32> to vector<8xf32>
    %93 = vector.shape_cast %92 : vector<8xf32> to vector<8x1xf32>
    %cst_37 = arith.constant 3.200000e+01 : f32
    %94 = vector.broadcast %cst_37 : f32 to vector<8x1xf32>
    %95 = arith.divf %93, %94 : vector<8x1xf32>
    %96 = vector.broadcast %95 : vector<8x1xf32> to vector<8x32xf32>
    %97 = arith.subf %87, %96 : vector<8x32xf32>
    %98 = arith.mulf %97, %97 : vector<8x32xf32>
    %cst_38 = arith.constant dense<0.000000e+00> : vector<8xf32>
    %99 = vector.multi_reduction <add>, %98, %cst_38 [1] : vector<8x32xf32> to vector<8xf32>
    %100 = vector.shape_cast %99 : vector<8xf32> to vector<8x1xf32>
    %cst_39 = arith.constant 3.200000e+01 : f32
    %101 = vector.broadcast %cst_39 : f32 to vector<8x1xf32>
    %102 = arith.divf %100, %101 : vector<8x1xf32>
    %103 = vector.broadcast %95 : vector<8x1xf32> to vector<8x32xf32>
    %104 = arith.subf %87, %103 : vector<8x32xf32>
    %cst_40 = arith.constant 9.99999974E-6 : f32
    %105 = vector.broadcast %cst_40 : f32 to vector<8x1xf32>
    %106 = arith.addf %102, %105 : vector<8x1xf32>
    %107 = math.rsqrt %106 : vector<8x1xf32>
    %108 = vector.broadcast %107 : vector<8x1xf32> to vector<8x32xf32>
    %109 = arith.mulf %104, %108 : vector<8x32xf32>
    %110 = vector.broadcast %89 : vector<1x32xf32> to vector<8x32xf32>
    %111 = arith.mulf %109, %110 : vector<8x32xf32>
    %112 = vector.broadcast %91 : vector<1x32xf32> to vector<8x32xf32>
    %113 = arith.addf %111, %112 : vector<8x32xf32>
    %114 = arith.truncf %113 : vector<8x32xf32> to vector<8x32xbf16>
    %c0_41 = arith.constant 0 : index
    %c0_42 = arith.constant 0 : index
    %c0_43 = arith.constant 0 : index
    %115 = vector.load %arg9[%c0_41, %c0_42, %c0_43] : memref<1x32x64xbf16, #tpu.memory_space<vmem>>, vector<1x32x64xbf16>
    %116 = vector.shape_cast %115 : vector<1x32x64xbf16> to vector<32x64xbf16>
    %cst_44 = arith.constant dense<0.000000e+00> : vector<8x64xf32>
    %117 = tpu.matmul %114, %116, %cst_44 {dimension_numbers = #tpu.dot_dimension_numbers<[1], [0], [0], [1], [0, 0, 1, 1], [], []>} : vector<8x32xbf16>, vector<32x64xbf16>, vector<8x64xf32> -> vector<8x64xf32>
    %c0_45 = arith.constant 0 : index
    %c0_46 = arith.constant 0 : index
    %c0_47 = arith.constant 0 : index
    %118 = vector.load %arg10[%c0_45, %c0_46, %c0_47] : memref<1x1x64xf32, #tpu.memory_space<vmem>>, vector<1x1x64xf32>
    %119 = vector.shape_cast %118 : vector<1x1x64xf32> to vector<1x64xf32>
    %120 = vector.broadcast %119 : vector<1x64xf32> to vector<8x64xf32>
    %121 = arith.addf %117, %120 : vector<8x64xf32>
    %cst_48 = arith.constant 0.000000e+00 : f32
    %122 = vector.broadcast %cst_48 : f32 to vector<8x64xf32>
    %123 = arith.maximumf %121, %122 : vector<8x64xf32>
    %124 = arith.truncf %123 : vector<8x64xf32> to vector<8x64xbf16>
    %c0_49 = arith.constant 0 : index
    %c0_50 = arith.constant 0 : index
    %c0_51 = arith.constant 0 : index
    %125 = vector.load %arg11[%c0_49, %c0_50, %c0_51] : memref<1x64x32xbf16, #tpu.memory_space<vmem>>, vector<1x64x32xbf16>
    %126 = vector.shape_cast %125 : vector<1x64x32xbf16> to vector<64x32xbf16>
    %cst_52 = arith.constant dense<0.000000e+00> : vector<8x32xf32>
    %127 = tpu.matmul %124, %126, %cst_52 {dimension_numbers = #tpu.dot_dimension_numbers<[1], [0], [0], [1], [0, 0, 1, 1], [], []>} : vector<8x64xbf16>, vector<64x32xbf16>, vector<8x32xf32> -> vector<8x32xf32>
    %c0_53 = arith.constant 0 : index
    %c0_54 = arith.constant 0 : index
    %c0_55 = arith.constant 0 : index
    %128 = vector.load %arg12[%c0_53, %c0_54, %c0_55] : memref<1x1x32xf32, #tpu.memory_space<vmem>>, vector<1x1x32xf32>
    %129 = vector.shape_cast %128 : vector<1x1x32xf32> to vector<1x32xf32>
    %130 = vector.broadcast %129 : vector<1x32xf32> to vector<8x32xf32>
    %131 = arith.addf %127, %130 : vector<8x32xf32>
    %132 = arith.addf %131, %113 : vector<8x32xf32>
    %c0_56 = arith.constant 0 : index
    %c0_57 = arith.constant 0 : index
    %c0_58 = arith.constant 0 : index
    %133 = vector.load %arg13[%c0_56, %c0_57, %c0_58] : memref<1x1x32xf32, #tpu.memory_space<vmem>>, vector<1x1x32xf32>
    %134 = vector.shape_cast %133 : vector<1x1x32xf32> to vector<1x32xf32>
    %c0_59 = arith.constant 0 : index
    %c0_60 = arith.constant 0 : index
    %c0_61 = arith.constant 0 : index
    %135 = vector.load %arg14[%c0_59, %c0_60, %c0_61] : memref<1x1x32xf32, #tpu.memory_space<vmem>>, vector<1x1x32xf32>
    %136 = vector.shape_cast %135 : vector<1x1x32xf32> to vector<1x32xf32>
    %cst_62 = arith.constant dense<0.000000e+00> : vector<8xf32>
    %137 = vector.multi_reduction <add>, %132, %cst_62 [1] : vector<8x32xf32> to vector<8xf32>
    %138 = vector.shape_cast %137 : vector<8xf32> to vector<8x1xf32>
    %cst_63 = arith.constant 3.200000e+01 : f32
    %139 = vector.broadcast %cst_63 : f32 to vector<8x1xf32>
    %140 = arith.divf %138, %139 : vector<8x1xf32>
    %141 = vector.broadcast %140 : vector<8x1xf32> to vector<8x32xf32>
    %142 = arith.subf %132, %141 : vector<8x32xf32>
    %143 = arith.mulf %142, %142 : vector<8x32xf32>
    %cst_64 = arith.constant dense<0.000000e+00> : vector<8xf32>
    %144 = vector.multi_reduction <add>, %143, %cst_64 [1] : vector<8x32xf32> to vector<8xf32>
    %145 = vector.shape_cast %144 : vector<8xf32> to vector<8x1xf32>
    %cst_65 = arith.constant 3.200000e+01 : f32
    %146 = vector.broadcast %cst_65 : f32 to vector<8x1xf32>
    %147 = arith.divf %145, %146 : vector<8x1xf32>
    %148 = vector.broadcast %140 : vector<8x1xf32> to vector<8x32xf32>
    %149 = arith.subf %132, %148 : vector<8x32xf32>
    %cst_66 = arith.constant 9.99999974E-6 : f32
    %150 = vector.broadcast %cst_66 : f32 to vector<8x1xf32>
    %151 = arith.addf %147, %150 : vector<8x1xf32>
    %152 = math.rsqrt %151 : vector<8x1xf32>
    %153 = vector.broadcast %152 : vector<8x1xf32> to vector<8x32xf32>
    %154 = arith.mulf %149, %153 : vector<8x32xf32>
    %155 = vector.broadcast %134 : vector<1x32xf32> to vector<8x32xf32>
    %156 = arith.mulf %154, %155 : vector<8x32xf32>
    %157 = vector.broadcast %136 : vector<1x32xf32> to vector<8x32xf32>
    %158 = arith.addf %156, %157 : vector<8x32xf32>
    %c0_67 = arith.constant 0 : index
    %c0_68 = arith.constant 0 : index
    %159 = vector.load %arg16[%c0_67, %c0_68] : memref<8x32xf32, #tpu.memory_space<vmem>>, vector<8x32xf32>
    tpu.vector_store %arg16[%c0_67, %c0_68], %158 {strides = array<i32>} : memref<8x32xf32, #tpu.memory_space<vmem>>, vector<8x32xf32>,
    %c1_i32 = arith.constant 1 : i32
    %160 = arith.cmpi eq, %arg1, %c1_i32 : i32
    %161 = arith.extui %160 : i1 to i32
    %c0_i32_69 = arith.constant 0 : i32
    %162 = arith.cmpi ne, %161, %c0_i32_69 : i32
    scf.if %162 {
      %c0_70 = arith.constant 0 : index
      %c0_71 = arith.constant 0 : index
      %163 = vector.load %arg15[%c0_70, %c0_71] : memref<8x32xf32, #tpu.memory_space<vmem>>, vector<8x32xf32>
      tpu.vector_store %arg15[%c0_70, %c0_71], %158 {strides = array<i32>} : memref<8x32xf32, #tpu.memory_space<vmem>>, vector<8x32xf32>,
    } else {
    }
    return
  }
  func.func @transform_0(%arg0: i32, %arg1: i32) -> (i32, i32) {
    %c0_i32 = arith.constant 0 : i32
    %c0_i32_0 = arith.constant 0 : i32
    %c0_i32_1 = arith.constant 0 : i32
    return %c0_i32, %c0_i32_0 : i32, i32
  }
  func.func @transform_1(%arg0: i32, %arg1: i32) -> (i32, i32) {
    %c0_i32 = arith.constant 0 : i32
    %c0_i32_0 = arith.constant 0 : i32
    return %arg0, %c0_i32 : i32, i32
  }
  func.func @transform_2(%arg0: i32, %arg1: i32) -> (i32, i32, i32) {
    %c0_i32 = arith.constant 0 : i32
    %c0_i32_0 = arith.constant 0 : i32
    %c0_i32_1 = arith.constant 0 : i32
    return %arg1, %c0_i32, %c0_i32_0 : i32, i32, i32
  }
  func.func @transform_3(%arg0: i32, %arg1: i32) -> (i32, i32, i32) {
    %c0_i32 = arith.constant 0 : i32
    %c0_i32_0 = arith.constant 0 : i32
    %c0_i32_1 = arith.constant 0 : i32
    return %arg1, %c0_i32, %c0_i32_0 : i32, i32, i32
  }
  func.func @transform_4(%arg0: i32, %arg1: i32) -> (i32, i32, i32) {
    %c0_i32 = arith.constant 0 : i32
    %c0_i32_0 = arith.constant 0 : i32
    %c0_i32_1 = arith.constant 0 : i32
    return %arg1, %c0_i32, %c0_i32_0 : i32, i32, i32
  }
  func.func @transform_5(%arg0: i32, %arg1: i32) -> (i32, i32, i32) {
    %c0_i32 = arith.constant 0 : i32
    %c0_i32_0 = arith.constant 0 : i32
    %c0_i32_1 = arith.constant 0 : i32
    return %arg1, %c0_i32, %c0_i32_0 : i32, i32, i32
  }
  func.func @transform_6(%arg0: i32, %arg1: i32) -> (i32, i32, i32) {
    %c0_i32 = arith.constant 0 : i32
    %c0_i32_0 = arith.constant 0 : i32
    %c0_i32_1 = arith.constant 0 : i32
    return %arg1, %c0_i32, %c0_i32_0 : i32, i32, i32
  }
  func.func @transform_7(%arg0: i32, %arg1: i32) -> (i32, i32, i32) {
    %c0_i32 = arith.constant 0 : i32
    %c0_i32_0 = arith.constant 0 : i32
    %c0_i32_1 = arith.constant 0 : i32
    return %arg1, %c0_i32, %c0_i32_0 : i32, i32, i32
  }
  func.func @transform_8(%arg0: i32, %arg1: i32) -> (i32, i32, i32) {
    %c0_i32 = arith.constant 0 : i32
    %c0_i32_0 = arith.constant 0 : i32
    %c0_i32_1 = arith.constant 0 : i32
    return %arg1, %c0_i32, %c0_i32_0 : i32, i32, i32
  }
  func.func @transform_9(%arg0: i32, %arg1: i32) -> (i32, i32, i32) {
    %c0_i32 = arith.constant 0 : i32
    %c0_i32_0 = arith.constant 0 : i32
    %c0_i32_1 = arith.constant 0 : i32
    return %arg1, %c0_i32, %c0_i32_0 : i32, i32, i32
  }
  func.func @transform_10(%arg0: i32, %arg1: i32) -> (i32, i32, i32) {
    %c0_i32 = arith.constant 0 : i32
    %c0_i32_0 = arith.constant 0 : i32
    %c0_i32_1 = arith.constant 0 : i32
    return %arg1, %c0_i32, %c0_i32_0 : i32, i32, i32
  }
  func.func @transform_11(%arg0: i32, %arg1: i32) -> (i32, i32, i32) {
    %c0_i32 = arith.constant 0 : i32
    %c0_i32_0 = arith.constant 0 : i32
    %c0_i32_1 = arith.constant 0 : i32
    return %arg1, %c0_i32, %c0_i32_0 : i32, i32, i32
  }
  func.func @transform_12(%arg0: i32, %arg1: i32) -> (i32, i32, i32) {
    %c0_i32 = arith.constant 0 : i32
    %c0_i32_0 = arith.constant 0 : i32
    %c0_i32_1 = arith.constant 0 : i32
    return %arg1, %c0_i32, %c0_i32_0 : i32, i32, i32
  }
  func.func @transform_13(%arg0: i32, %arg1: i32) -> (i32, i32) {
    %c0_i32 = arith.constant 0 : i32
    %c0_i32_0 = arith.constant 0 : i32
    return %arg0, %c0_i32 : i32, i32
  }
}

</mosaic_0001>

<bundles_post_ra>
// kernel: tpu_custom_call.1
= control target key start
LH: loop header
LB: loop body
LE: loop exit
PB: predicated region body
PF: predicated region fallthrough
CT: control target
= control target key end

     0   :  { %s2461_s0 = inlined_call_operand.vmem [shape: f32[8,8], index: 0, kind: input, shape index: {}]   ;;  %s2462_s1 = inlined_call_operand.vmem [shape: f32[16,32], index: 1, kind: input, shape index: {}]   ;;  %s2463_s2 = inlined_call_operand.vmem [shape: bf16[2,32,192], index: 2, kind: input, shape index: {}]   ;;  %s2464_s3 = inlined_call_operand.vmem [shape: bf16[2,64,32], index: 3, kind: input, shape index: {}]   ;;  %s2465_s4 = inlined_call_operand.vmem [shape: f32[2,1,32], index: 4, kind: input, shape index: {}]   ;;  %s2466_s5 = inlined_call_operand.vmem [shape: f32[2,1,32], index: 5, kind: input, shape index: {}]   ;;  %s2467_s6 = inlined_call_operand.vmem [shape: f32[2,1,32], index: 6, kind: input, shape index: {}]   ;;  %s2468_s7 = inlined_call_operand.vmem [shape: bf16[2,32,64], index: 7, kind: input, shape index: {}]   ;;  %s2469_s8 = inlined_call_operand.vmem [shape: f32[2,1,64], index: 8, kind: input, shape index: {}]   ;;  %s2470_s9 = inlined_call_operand.vmem [shape: bf16[2,64,32], index: 9, kind: input, shape index: {}]   ;;  %s2471_s10 = inlined_call_operand.vmem [shape: f32[2,1,32], index: 10, kind: input, shape index: {}]   ;;  %s2472_s11 = inlined_call_operand.vmem [shape: f32[2,1,32], index: 11, kind: input, shape index: {}]   ;;  %s2473_s12 = inlined_call_operand.vmem [shape: f32[2,1,32], index: 12, kind: input, shape index: {}]   ;;  %s2474_s13 = inlined_call_operand.hbm [shape: f32[16,32], index: 13, kind: output, shape index: {}]  }
   0x1   :  { %2490 = sst [smem:[#allocation19_spill]] %s2461_s0 }
   0x2   :  { %2491 = sst [smem:[#allocation20_spill]] %s2462_s1 }
   0x3   :  { %2492 = sst [smem:[#allocation21_spill]] %s2463_s2 }
   0x4   :  { %2493 = sst [smem:[#allocation22_spill]] %s2464_s3 }
   0x5   :  { %2494 = sst [smem:[#allocation23_spill]] %s2468_s7 }
   0x6   :  { %2495 = sst [smem:[#allocation24_spill]] %s2474_s13 }
   0x7   :  { %18 = vsyncpa [#allocation4], 0 }
   0x8   :  { %20 = vsyncpa [#allocation4 + $0x1], 0  ;;  %s2123_s25 = smov 0   ;;  %s2125_s26 = smov 0  }
   0x9   :  { %s2127_s27 = smov 0   ;;  %s2129_s28 = smov 0  }
   0xa   :  { %s2131_s29 = smov 0   ;;  %s2133_s30 = smov 0  }
   0xb   :  { %s2135_s14 = smov 0   ;;  %s2137_s15 = smov 0  }
   0xc LB: > { %2496 = sst [smem:[#allocation6_spill]] %s2012_s25  ;;  %s1662_s16 = sadd.s32 4294967295, %s2040_s15   ;;  %s2040_s15 = sphi %s2137_s15, %s26_s15   ;;  %s2036_s14 = sphi %s2135_s14, %s2535_s14   ;;  %s2032_s30 = sphi %s2133_s30, %s2534_s30   ;;  %s2028_s29 = sphi %s2131_s29, %s2533_s29   ;;  %s2024_s28 = sphi %s2129_s28, %s2532_s28   ;;  %s2020_s27 = sphi %s2127_s27, %s2531_s27   ;;  %s2016_s26 = sphi %s2125_s26, %s2530_s26   ;;  %s2012_s25 = sphi %s2123_s25, %s2529_s25  }
   0xd   : > { %2497 = sst [smem:[#allocation7_spill]] %s2016_s26  ;;  %s1663_s17 = sadd.s32 4294967294, %s2040_s15  }
   0xe   : > { %2498 = sst [smem:[#allocation8_spill]] %s2020_s27  ;;  %s35_s18 = sadd.s32 1, %s2032_s30 }
   0xf   : > { %2499 = sst [smem:[#allocation9_spill]] %s2024_s28  ;;  %p36_p0 = scmp.ge.s32.totalorder %s35_s18, 2 }
  0x10   : > { %2500 = sst [smem:[#allocation10_spill]] %s2028_s29  ;;  %s38_s19 = sadd.s32 1, %s2036_s14 }
  0x11   : > { %2501 = sst [smem:[#allocation11_spill]] %s2032_s30  ;;  %p388_p1 = scmp.ne.s32.totalorder %s2020_s27, %s2016_s26 }
  0x12   : > { %2502 = sst [smem:[#allocation12_spill]] %s2036_s14  ;;  %p389_p2 = scmp.eq.s32.totalorder %s1662_s16, 3 }
  0x13   : > { %2503 = sst [smem:[#allocation13_spill]] %s2040_s15  ;;  %s2537_s18 = smov (%p36_p0, %s35_s18), 0 }
  0x14   : > { %2504 = sst [smem:[#allocation14_spill]] %s2537_s18  ;;  %s2539_s19 = smov (!%p36_p0, %s38_s19), %s2036_s14 }
  0x15   : > { %p2172_p3 = por %p389_p2, %p388_p1  ;;  %p394_p4 = scmp.ne.s32.totalorder %s2016_s26, %s2012_s25 }
  0x16   : > { %p40_p5 = scmp.ge.s32.totalorder %s2539_s19, 2  ;;  %p395_p6 = scmp.eq.s32.totalorder %s1663_s17, 3 }
  0x17   : > { %s2505_s20 = scalar_select %p2172_p3, 1, 0 }
  0x18   : > { %p1666_p7 = scmp.ge.s32.totalorder %s2040_s15, 1  ;;  %p497_p8 = scmp.lt.s32.totalorder %s2040_s15, 5 }
  0x19   : > { %2506 = sst [smem:[#allocation15_spill]] %s2505_s20  ;;  %s2541_s19 = smov (%p40_p5, %s2539_s19), 0 }
  0x1a   : > { %2507 = sst [smem:[#allocation16_spill]] %s2541_s19  ;;  %p2182_p9 = por %p395_p6, %p394_p4 }
  0x1b   : > { %p498_p10 = pnand %p1666_p7, %p497_p8  ;;  %s375_s22 = ssub.s32 %s2036_s14, %s2541_s19 }
  0x1c   : > { %s2508_s21 = scalar_select %p2182_p9, 1, 0 }
  0x1d   : > { %s378_s23 = sadd.s32 1, %s2020_s27  ;;  %p376_p11 = scmp.eq.s32.totalorder %s375_s22, 0 }
  0x1e   : > { %2509 = sst [smem:[#allocation17_spill]] %s2508_s21  ;;  %501 = sbr.rel (%p498_p10) target bundleno = 2626 (0xa42), region = 72 }
  0x1f   : > { %s2190_s24 = scalar_select %p376_p11, %s2020_s27, %s378_s23  }
  0x20   : > { %s2477_s16 = sand.u32 (!%p498_p10), 1, %s2016_s26   ;;  %p581_p12 = scmp.lt.s32.totalorder (!%p498_p10), %s2028_s29, 1 }
  0x21   : > { %2510 = sst [smem:[#allocation18_spill]] %s2190_s24  ;;  %s2196_s17 = sshll.u32 (!%p498_p10), %s2477_s16, 3 }
  0x22   : > { %p585_p13 = scmp.lt.s32.totalorder (!%p498_p10), %s2024_s28, 1  ;;  %s2511_s1 = sld [smem:[#allocation20_spill]] (!%p498_p10) }
  0x23   : > { %s2512_s2 = sld [smem:[#allocation21_spill]] (!%p498_p10)  ;;  %s2513_s3 = sld [smem:[#allocation22_spill]] (!%p498_p10) }
  0x24   : > { %s2514_s7 = sld [smem:[#allocation23_spill]] (!%p498_p10)  ;;  %s2515_s25 = sld [smem:[#allocation9_spill]] (!%p498_p10) }
  0x25   : > { %s582_s18 = scalar_select %p581_p12, %s2028_s29, 1 }
  0x26   : > { %s2201_s30 = scalar_select %p585_p13, %s2024_s28, 1 }
  0x27   : > { %s1668_s22 = sshll.u32 %s582_s18, 3 }
  0x28   : > { %s584_s16 = scalar_lea.vmem %s2511_s1, %s1668_s22  ;;  %s1716_s14 = sshll.u32 %s2201_s30, 5 }
  0x29   : > { %s589_s21 = scalar_lea.vmem %s2512_s2, %s1716_s14  ;;  %s2213_s13 = scalar_lea.vmem %s2513_s3, %s1716_s14 }
  0x2a   : > { %s1718_s1 = sshll.u32 %s2201_s30, 4  ;;  %s611_s3 = scalar_lea.vmem %s2469_s8, %s2201_s30 }
  0x2b   : > { %s2231_s2 = scalar_lea.vmem %s2514_s7, %s1718_s1  ;;  %s2240_s29 = scalar_lea.vmem %s2470_s9, %s1716_s14 }
  0x2c   : > { %s619_s19 = scalar_lea.vmem %s2471_s10, %s2201_s30  ;;  %s622_s28 = scalar_lea.vmem %s2472_s11, %s2201_s30 }
  0x2d   : > { %s625_s24 = scalar_lea.vmem %s2473_s12, %s2201_s30  ;;  %s580_s7 = scalar_lea.vmem [#allocation3], %s2196_s17 }
  0x2e   : > { %p1677_p0 = scmp.ne.s32.totalorder %s2515_s25, 0 }
  0x2f   : > { %v631_v0 = vld [vmem:[%s584_s16] sm:$0xff] (!%p1677_p0)  ;;  %vm632_vm0 = vcmask (!%p1677_p0), 261120  }
  0x30   : > { %630 = sbr.rel (%p1677_p0) target bundleno = 55 (0x37), region = 76  ;;  %633 = vst.msk [vmem:[#allocation2] sm:$0xff] (!%p1677_p0), %vm632_vm0, %v631_v0 }
  0x37 PF: > { %v1910_v1 = vld [vmem:[%s589_s21 + $0x4] ss:$8 sps:$4 sm:$0xff]   ;;  %v1912_v2 = vld [vmem:[%s589_s21] ss:$8 sps:$4 sm:$0xff]   ;;  %v2042_v3 = vmov 0   ;;  %vm660_vm1 = vcmask 261120   ;;  %s2517_s1 = scalar_lea.vmem %s2465_s4, %s2201_s30 }
  0x38   : > { %696 = vmatprep.mubr.bf16.mxu1 %v2042_v3  ;;  %664 = vmatprep.subr.bf16.mxu1 %v1910_v1  ;;  %v1913_v4 = vld [vmem:[%s589_s21 + $0x14] ss:$8 sps:$4 sm:$0xff]   ;;  %v1915_v5 = vld [vmem:[%s589_s21 + $0x10] ss:$8 sps:$4 sm:$0xff]   ;;  %v2256_v6 = vld [vmem:[#allocation2] sm:$0xff]  ;;  %v2043_v8 = vmov 0.0  }
  0x39   : > { %665 = vmatpush1.bf16.msra.mxu1 %v1912_v2  ;;  %v635_v7 = vpack.c.bf16 %v2256_v6, %v2256_v6  ;;  %1755 = vmatprep.subr.bf16.mxu0 %v2043_v8  ;;  %vm2044_vm2 = vmmov 0   ;;  %vm774_vm3 = vcmask 1043456   ;;  %s2045_s14 = smov 112   ;;  %s2046_s21 = smov 64   ;;  %vm711_vm4 = vcmask 130048  }
  0x3a   : > { %666 = vmatprep.subr.bf16.mxu1 %v1913_v4  ;;  %1757 = vmatprep.mubr.msk.bf16.mxu0 %vm2044_vm2, %v2043_v8  ;;  %s2047_s16 = smov 32   ;;  %s2048_s23 = smov 48   ;;  %vm758_vm5 = vcmask 64512   ;;  %vm1163_vm6 = vcmask 392192   ;;  %vm1205_vm7 = vcmask 523264  }
  0x3b   : > { %s2049_s15 = smov 16   ;;  %s2050_s26 = smov 96  }
  0x3c   : > { %s2051_s20 = smov 80   ;;  %s2516_s22 = sld [smem:[#allocation19_spill]] }
  0x3d   : > { %667 = vmatpush1.bf16.msra.mxu1 %v1915_v5 }
  0x3e   : > { %1749 = vmatprep.subr.bf16.mxu1 %v2043_v8 }
  0x40   : > { %1682 = vmatmul.mubr.msk.bf16.vlgmr.msra.gmra.mrb[0].mxu1 %vm660_vm1, %v635_v7 }
  0x41   : > { %1751 = vmatprep.mubr.msk.bf16.mxu1 %vm2044_vm2, %v2043_v8 }
  0x42   : > { %v707_v27 = vld [vmem:[%s2516_s22] sm:$0xff]  ;;  %s2520_s22 = sld [smem:[#allocation9_spill]] }
  0x48   : > { %p1711_p1 = scmp.ne.s32.totalorder %s2520_s22, 1 }
 0x113   : > { %v698_v9 = vpop.f32.mrb[0].mxu1 }
 0x114   : > { %v705_v10 = vpack.c.bf16 %v698_v9, %v698_v9  ;;  %v700_v11 = vpop.f32.mrb[1].mxu1 }
 0x115   : > { %v2267_v12 = vpack.c.bf16 %v700_v11, %v700_v11  ;;  %v702_v13 = vpop.f32.mrb[2].mxu1 }
 0x116   : > { %818 = vrot.lane.b32.xlu1 %v705_v10, %s2045_s14  ;;  %709 = vrot.lane.b32.xlu0 %v705_v10, %s2046_s21  ;;  %v703_v14 = vpop.f32.mrb[3].mxu1  ;;  %s2518_s21 = scalar_lea.vmem %s2466_s5, %s2201_s30 }
 0x117   : > { %v776_v15 = vsel %vm774_vm3, %v2267_v12, 0 }
 0x118   : > { %1756 = vmatpush3.bf16.msra.mxu0 %v776_v15 }
 0x119   : > { %1767 = vmatprep.subr.bf16.mxu0 %v2043_v8 }
 0x11a   : > { %931 = vrot.lane.b32.xlu1 %v705_v10, %s2047_s16  ;;  %820 = vrot.lane.b32.xlu0 %v705_v10, %s2048_s23 }
 0x11e   : > { %1041 = vrot.lane.b32.xlu1 %v705_v10, %s2049_s15  ;;  %929 = vrot.lane.b32.xlu0 %v705_v10, %s2050_s26 }
 0x122   : > { %1039 = vrot.lane.b32.xlu0 %v705_v10, %s2051_s20 }
 0x188   : > { %v710_v16 = vpop.permute.xlu0 %709  ;;  %v819_v19 = vpop.permute.xlu1 %818 }
 0x189   : > { %v716_v17 = vsel %vm711_vm4, %v710_v16, 0 }
 0x18a   : > { %1750 = vmatpush3.bf16.xpose.msra.mxu1 %v716_v17 }
 0x18b   : > { %1761 = vmatprep.subr.bf16.mxu1 %v2043_v8 }
 0x18c   : > { %v821_v18 = vpop.permute.xlu0 %820  ;;  %v932_v21 = vpop.permute.xlu1 %931 }
 0x18d   : > { %v826_v20 = vsel %vm711_vm4, %v821_v18, 0  ;;  %v937_v22 = vsel %vm711_vm4, %v932_v21, 0 }
 0x190   : > { %v1042_v23 = vpop.permute.xlu1 %1041  ;;  %v930_v24 = vpop.permute.xlu0 %929 }
 0x191   : > { %1752 = vmatmul.mubr.msk.bf16.vlgmr.msra.gmra.mrb[4].mxu1 %vm711_vm4, %v705_v10  ;;  %v1047_v25 = vsel %vm711_vm4, %v1042_v23, 0 }
 0x192   : > { %1762 = vmatpush3.bf16.xpose.msra.mxu1 %v826_v20  ;;  %1763 = vmatprep.mubr.msk.bf16.mxu1 %vm2044_vm2, %v2043_v8 }
 0x193   : > { %1773 = vmatprep.subr.bf16.mxu1 %v2043_v8 }
 0x194   : > { %v1040_v26 = vpop.permute.xlu0 %1039 }
 0x199   : > { %1764 = vmatmul.mubr.msk.bf16.vlgmr.msra.gmra.mrb[8].mxu1 %vm711_vm4, %v819_v19 }
 0x19a   : > { %1774 = vmatpush3.bf16.xpose.msra.mxu1 %v937_v22  ;;  %1775 = vmatprep.mubr.msk.bf16.mxu1 %vm2044_vm2, %v2043_v8 }
 0x19b   : > { %1785 = vmatprep.subr.bf16.mxu1 %v2043_v8 }
 0x1a1   : > { %1776 = vmatmul.mubr.msk.bf16.vlgmr.msra.gmra.mrb[12].mxu1 %vm711_vm4, %v930_v24 }
 0x1a2   : > { %1786 = vmatpush3.bf16.xpose.msra.mxu1 %v1047_v25  ;;  %1787 = vmatprep.mubr.msk.bf16.mxu1 %vm2044_vm2, %v2043_v8 }
 0x1a3   : > { %1797 = vmatprep.subr.bf16.mxu1 %v2043_v8 }
 0x1a9   : > { %1788 = vmatmul.mubr.msk.bf16.vlgmr.msra.gmra.mrb[16].mxu1 %vm711_vm4, %v1040_v26 }
 0x1aa   : > { %1805 = vmatprep.mubr.msk.bf16.mxu1 %vm2044_vm2, %v2043_v8 }
 0x264   : > { %v752_v28 = vpop.f32.mrb[4].mxu1 }
 0x265   : > { %v753_v29 = vadd.f32 %v752_v28, %v707_v27  ;;  %v1753_v30 = vpop.f32.mrb[5].mxu1 }
 0x266   : > { %v755_v31 = vpop.f32.mrb[6].mxu1 }
 0x267   : > { %v1754_v32 = vpop.f32.mrb[7].mxu1  ;;  %v759_v33 = vsel %vm758_vm5, %v753_v29, -inf }
 0x268   : > { %760 = vmax.xlane.f32.xlu1 %v759_v33 }
 0x26c   : > { %v862_v34 = vpop.f32.mrb[8].mxu1 }
 0x26d   : > { %v863_v35 = vadd.f32 %v862_v34, %v707_v27  ;;  %v1765_v36 = vpop.f32.mrb[9].mxu1 }
 0x26e   : > { %v865_v37 = vpop.f32.mrb[10].mxu1  ;;  %v1916_v36 = vld [vmem:[%s2213_s13] sm:$0xff]  }
 0x26f   : > { %v1766_v38 = vpop.f32.mrb[11].mxu1  ;;  %v868_v39 = vsel %vm758_vm5, %v863_v35, -inf  ;;  %1798 = vmatpush3.bf16.msra.mxu1 %v1916_v36  ;;  %v1917_v37 = vld [vmem:[%s2213_s13 + $0x8] sm:$0xff]  }
 0x270   : > { %869 = vmax.xlane.f32.xlu0 %v868_v39  ;;  %1799 = vmatprep.subr.bf16.mxu1 %v2043_v8 }
 0x273   : > { %1800 = vmatpush3.bf16.msra.mxu1 %v1917_v37 }
 0x274   : > { %v973_v40 = vpop.f32.mrb[12].mxu1  ;;  %1801 = vmatprep.subr.bf16.mxu1 %v2043_v8 }
 0x275   : > { %v974_v41 = vadd.f32 %v973_v40, %v707_v27  ;;  %v1777_v42 = vpop.f32.mrb[13].mxu1 }
 0x276   : > { %v976_v43 = vpop.f32.mrb[14].mxu1 }
 0x277   : > { %v1778_v44 = vpop.f32.mrb[15].mxu1  ;;  %v979_v45 = vsel %vm758_vm5, %v974_v41, -inf }
 0x278   : > { %980 = vmax.xlane.f32.xlu0 %v979_v45 }
 0x27c   : > { %v1083_v46 = vpop.f32.mrb[16].mxu1 }
 0x27d   : > { %v1084_v47 = vadd.f32 %v1083_v46, %v707_v27  ;;  %v1789_v48 = vpop.f32.mrb[17].mxu1 }
 0x27e   : > { %v1086_v49 = vpop.f32.mrb[18].mxu1 }
 0x27f   : > { %v1790_v50 = vpop.f32.mrb[19].mxu1  ;;  %v1089_v51 = vsel %vm758_vm5, %v1084_v47, -inf }
 0x280   : > { %1090 = vmax.xlane.f32.xlu1 %v1089_v51 }
 0x2f5   : > { %v761_v52 = vpop.xlane.xlu1 %760 }
 0x2f6   : > { %v762_v53 = vsub.f32 %v753_v29, %v761_v52 }
 0x2f8   : > { %v763_v54 = vmul.f32 1.442695, %v762_v53 }
 0x2fa   : > { %1926 = vpow2.f32 %v763_v54 }
 0x2fd   : > { %v870_v55 = vpop.xlane.xlu0 %869 }
 0x2fe   : > { %v871_v56 = vsub.f32 %v863_v35, %v870_v55 }
 0x300   : > { %v872_v57 = vmul.f32 1.442695, %v871_v56 }
 0x302   : > { %1928 = vpow2.f32 %v872_v57 }
 0x304   : > { %v1927_v58 = vpop.eup %1926 }
 0x305   : > { %v981_v59 = vpop.xlane.xlu0 %980  ;;  %v765_v60 = vsel %vm758_vm5, %v1927_v58, 0.0 }
 0x306   : > { %v982_v61 = vsub.f32 %v974_v41, %v981_v59  ;;  %766 = vadd.xlane.f32.xlu0 %v765_v60  ;;  %v1918_v41 = vld [vmem:[%s2213_s13 + $0x10] sm:$0xff]   ;;  %v1691_v59 = vld [vmem:[%s2517_s1] ss:$0 sm:$0xff] }
 0x307   : > { %1802 = vmatpush3.bf16.msra.mxu1 %v1918_v41 }
 0x308   : > { %v983_v62 = vmul.f32 1.442695, %v982_v61  ;;  %1803 = vmatprep.subr.bf16.mxu1 %v2043_v8 }
 0x30a   : > { %1930 = vpow2.f32 %v983_v62 }
 0x30c   : > { %v1929_v63 = vpop.eup %1928 }
 0x30d   : > { %v874_v0 = vsel %vm758_vm5, %v1929_v63, 0.0  ;;  %v1091_v3 = vpop.xlane.xlu1 %1090 }
 0x30e   : > { %875 = vadd.xlane.f32.xlu1 %v874_v0  ;;  %v1092_v4 = vsub.f32 %v1084_v47, %v1091_v3  ;;  %v1919_v47 = vld [vmem:[%s2213_s13 + $0x18] sm:$0xff]  }
 0x30f   : > { %1804 = vmatpush3.bf16.msra.mxu1 %v1919_v47 }
 0x310   : > { %v1093_v5 = vmul.f32 1.442695, %v1092_v4 }
 0x312   : > { %1932 = vpow2.f32 %v1093_v5 }
 0x314   : > { %v1931_v1 = vpop.eup %1930 }
 0x315   : > { %v985_v2 = vsel %vm758_vm5, %v1931_v1, 0.0 }
 0x316   : > { %986 = vadd.xlane.f32.xlu0 %v985_v2 }
 0x31c   : > { %v1933_v7 = vpop.eup %1932 }
 0x31d   : > { %v1095_v9 = vsel %vm758_vm5, %v1933_v7, 0.0 }
 0x31f   : > { %991 = vrot.lane.b32.xlu1 %v2267_v12, %s2050_s26 }
 0x32c   : > { %881 = vrot.lane.b32.xlu0 %v2267_v12, %s2045_s14 }
 0x343   : > { %1096 = vadd.xlane.f32.xlu1 %v1095_v9 }
 0x354   : > { %1101 = vrot.lane.b32.xlu1 %v2267_v12, %s2051_s20 }
 0x393   : > { %v767_v10 = vpop.xlane.xlu0 %766 }
 0x394   : > { %1934 = vrcp.f32 %v767_v10  ;;  %v1920_v10 = vld [vmem:[%s2231_s2] sm:$0xff]  }
 0x39b   : > { %v876_v11 = vpop.xlane.xlu1 %875 }
 0x39c   : > { %1936 = vrcp.f32 %v876_v11  ;;  %v1921_v11 = vld [vmem:[%s2231_s2 + $0x8] sm:$0xff]   ;;  %s2519_s2 = scalar_lea.vmem %s2467_s6, %s2201_s30 }
 0x39e   : > { %v1935_v13 = vpop.eup %1934 }
 0x39f   : > { %v769_v14 = vmul.f32 %v1935_v13, %v1927_v58  ;;  %v992_v12 = vpop.permute.xlu1 %991 }
 0x3a0   : > { %v997_v22 = vsel %vm774_vm3, %v992_v12, 0  ;;  %v1922_v12 = vld [vmem:[%s2240_s29] sm:$0xff]  }
 0x3a1   : > { %v770_v15 = vpack.c.bf16 %v769_v14, %v769_v14 }
 0x3a3   : > { %1758 = vmatmul.mubr.msk.bf16.vlgmr.msra.gmra.mrb[0].mxu0 %vm758_vm5, %v770_v15  ;;  %v987_v16 = vpop.xlane.xlu0 %986 }
 0x3a4   : > { %1938 = vrcp.f32 %v987_v16  ;;  %1769 = vmatprep.mubr.msk.bf16.mxu0 %vm2044_vm2, %v2043_v8  ;;  %v1697_v16 = vld [vmem:[%s2518_s21] ss:$0 sm:$0xff] }
 0x3a6   : > { %v1937_v17 = vpop.eup %1936 }
 0x3a7   : > { %v878_v18 = vmul.f32 %v1937_v17, %v1929_v63  ;;  %v882_v19 = vpop.permute.xlu0 %881 }
 0x3a8   : > { %v887_v20 = vsel %vm774_vm3, %v882_v19, 0 }
 0x3a9   : > { %1768 = vmatpush3.bf16.msra.mxu0 %v887_v20  ;;  %v879_v21 = vpack.c.bf16 %v878_v18, %v878_v18  ;;  %v1698_v18 = vld [vmem:[%s2519_s2] ss:$0 sm:$0xff] }
 0x3aa   : > { %1779 = vmatprep.subr.bf16.mxu0 %v2043_v8 }
 0x3ac   : > { %1770 = vmatmul.mubr.msk.bf16.vlgmr.msra.gmra.mrb[4].mxu0 %vm758_vm5, %v879_v21 }
 0x3ad   : > { %1780 = vmatpush3.bf16.msra.mxu0 %v997_v22  ;;  %1781 = vmatprep.mubr.msk.bf16.mxu0 %vm2044_vm2, %v2043_v8  ;;  %v1923_v22 = vld [vmem:[%s2240_s29 + $0x8] sm:$0xff]  }
 0x3ae   : > { %v1939_v23 = vpop.eup %1938  ;;  %1791 = vmatprep.subr.bf16.mxu0 %v2043_v8 }
 0x3af   : > { %v989_v24 = vmul.f32 %v1939_v23, %v1931_v1  ;;  %v1924_v23 = vld [vmem:[%s2240_s29 + $0x10] sm:$0xff]  }
 0x3b1   : > { %v990_v25 = vpack.c.bf16 %v989_v24, %v989_v24  ;;  %v1925_v24 = vld [vmem:[%s2240_s29 + $0x18] sm:$0xff]  }
 0x3b4   : > { %1782 = vmatmul.mubr.msk.bf16.vlgmr.msra.gmra.mrb[8].mxu0 %vm758_vm5, %v990_v25  ;;  %v1699_v25 = vld [vmem:[%s611_s3] ss:$0 sm:$0xff] }
 0x3b5   : > { %1793 = vmatprep.mubr.msk.bf16.mxu0 %vm2044_vm2, %v2043_v8 }
 0x3d0   : > { %v1097_v26 = vpop.xlane.xlu1 %1096 }
 0x3d1   : > { %1940 = vrcp.f32 %v1097_v26 }
 0x3d4   : > { %v1102_v27 = vpop.permute.xlu1 %1101 }
 0x3d5   : > { %v1107_v28 = vsel %vm774_vm3, %v1102_v27, 0 }
 0x3d6   : > { %1792 = vmatpush3.bf16.msra.mxu0 %v1107_v28 }
 0x3d7   : > { %1809 = vmatprep.subr.bf16.mxu0 %v2043_v8 }
 0x3db   : > { %v1941_v29 = vpop.eup %1940 }
 0x3dc   : > { %v1099_v30 = vmul.f32 %v1941_v29, %v1933_v7 }
 0x3de   : > { %v1100_v31 = vpack.c.bf16 %v1099_v30, %v1099_v30 }
 0x3e0   : > { %1794 = vmatmul.mubr.msk.bf16.vlgmr.msra.gmra.mrb[12].mxu0 %vm758_vm5, %v1100_v31 }
 0x3e1   : > { %1813 = vmatprep.mubr.msk.bf16.mxu0 %vm2044_vm2, %v2043_v8  ;;  %1810 = vmatpush3.bf16.msra.mxu0 %v1920_v10 }
 0x3e2   : > { %1811 = vmatprep.subr.bf16.mxu0 %v2043_v8 }
 0x3e5   : > { %1812 = vmatpush3.bf16.msra.mxu0 %v1921_v11 }
 0x3e6   : > { %1817 = vmatprep.subr.bf16.mxu0 %v2043_v8 }
 0x476   : > { %v812_v32 = vpop.f32.mrb[0].mxu0 }
 0x477   : > { %v1759_v33 = vpop.f32.mrb[1].mxu0 }
 0x478   : > { %v815_v34 = vpop.f32.mrb[2].mxu0 }
 0x479   : > { %v1760_v35 = vpop.f32.mrb[3].mxu0 }
 0x47f   : > { %v923_v38 = vpop.f32.mrb[4].mxu0 }
 0x480   : > { %1150 = vrot.lane.b32.xlu0 %v923_v38, %s2049_s15  ;;  %v1771_v39 = vpop.f32.mrb[5].mxu0 }
 0x481   : > { %v926_v40 = vpop.f32.mrb[6].mxu0 }
 0x482   : > { %v1772_v42 = vpop.f32.mrb[7].mxu0 }
 0x487   : > { %v1033_v43 = vpop.f32.mrb[8].mxu0 }
 0x488   : > { %1154 = vrot.lane.b32.xlu1 %v1033_v43, %s2047_s16  ;;  %v1783_v44 = vpop.f32.mrb[9].mxu0 }
 0x489   : > { %v1036_v45 = vpop.f32.mrb[10].mxu0 }
 0x48a   : > { %v1784_v46 = vpop.f32.mrb[11].mxu0 }
 0x4b3   : > { %v1143_v48 = vpop.f32.mrb[12].mxu0 }
 0x4b4   : > { %1158 = vrot.lane.b32.xlu0 %v1143_v48, %s2048_s23  ;;  %v1795_v49 = vpop.f32.mrb[13].mxu0 }
 0x4b5   : > { %v1146_v50 = vpop.f32.mrb[14].mxu0  ;;  %v1709_v49 = vld [vmem:[%s622_s28] ss:$0 sm:$0xff] }
 0x4b6   : > { %v1796_v51 = vpop.f32.mrb[15].mxu0 }
 0x4b7   : > { %v1710_v51 = vld [vmem:[%s625_s24] ss:$0 sm:$0xff] }
 0x4f2   : > { %v1151_v52 = vpop.permute.xlu0 %1150 }
 0x4f3   : > { %v1161_v54 = vsel %vm711_vm4, %v812_v32, %v1151_v52 }
 0x4fa   : > { %v1155_v53 = vpop.permute.xlu1 %1154 }
 0x4fb   : > { %v1162_v55 = vsel %vm660_vm1, %v1161_v54, %v1155_v53 }
 0x526   : > { %v1159_v56 = vpop.permute.xlu0 %1158 }
 0x527   : > { %v1164_v57 = vsel %vm1163_vm6, %v1162_v55, %v1159_v56 }
 0x528   : > { %v1165_v58 = vpack.c.bf16 %v1164_v57, %v1164_v57 }
 0x52a   : > { %1806 = vmatmul.mubr.msk.bf16.vlgmr.msra.gmra.mrb[20].mxu1 %vm1205_vm7, %v1165_v58 }
 0x5fd   : > { %v1243_v60 = vpop.f32.mrb[20].mxu1 }
 0x5fe   : > { %v1244_v61 = vadd.f32 %v1691_v59, %v1243_v60  ;;  %v1807_v62 = vpop.f32.mrb[21].mxu1 }
 0x5ff   : > { %v1246_v63 = vpop.f32.mrb[22].mxu1 }
 0x600   : > { %v1808_v0 = vpop.f32.mrb[23].mxu1  ;;  %v1249_v1 = vadd.f32 %v1244_v61, %v2256_v6 }
 0x602   : > { %v1252_v2 = vsel %vm660_vm1, %v1249_v1, 0.0 }
 0x603   : > { %1253 = vadd.xlane.f32.xlu1 %v1252_v2 }
 0x690   : > { %v1254_v3 = vpop.xlane.xlu1 %1253 }
 0x691   : > { %v1256_v4 = vmul.f32 0.03125, %v1254_v3 }
 0x693   : > { %v1257_v5 = vsub.f32 %v1249_v1, %v1256_v4 }
 0x695   : > { %v1258_v7 = vmul.f32 %v1257_v5, %v1257_v5 }
 0x697   : > { %v1259_v9 = vsel %vm660_vm1, %v1258_v7, 0.0 }
 0x698   : > { %1260 = vadd.xlane.f32.xlu0 %v1259_v9 }
 0x725   : > { %v1261_v6 = vpop.xlane.xlu0 %1260 }
 0x726   : > { %v1262_v13 = vmul.f32 0.03125, %v1261_v6 }
 0x728   : > { %v1263_v14 = vadd.f32 1e-05, %v1262_v13 }
 0x72a   : > { %1942 = vrsqrt.f32 %v1263_v14 }
 0x734   : > { %v1943_v15 = vpop.eup %1942 }
 0x735   : > { %v1265_v17 = vmul.f32 %v1943_v15, %v1257_v5 }
 0x737   : > { %v1272_v19 = vmul.f32 %v1697_v16, %v1265_v17 }
 0x739   : > { %v1279_v20 = vadd.f32 %v1698_v18, %v1272_v19 }
 0x73b   : > { %v1280_v21 = vpack.c.bf16 %v1279_v20, %v1279_v20 }
 0x73d   : > { %1814 = vmatmul.mubr.msk.bf16.vlgmr.msra.gmra.mrb[16].mxu0 %vm660_vm1, %v1280_v21 }
 0x73e   : > { %1818 = vmatpush3.bf16.msra.mxu0 %v1922_v12  ;;  %1825 = vmatprep.mubr.msk.bf16.mxu0 %vm2044_vm2, %v2043_v8 }
 0x73f   : > { %1819 = vmatprep.subr.bf16.mxu0 %v2043_v8 }
 0x742   : > { %1820 = vmatpush3.bf16.msra.mxu0 %v1923_v22 }
 0x743   : > { %1821 = vmatprep.subr.bf16.mxu0 %v2043_v8 }
 0x746   : > { %1822 = vmatpush3.bf16.msra.mxu0 %v1924_v23 }
 0x747   : > { %1823 = vmatprep.subr.bf16.mxu0 %v2043_v8  ;;  %v1703_v8 = vld [vmem:[%s619_s19] ss:$0 sm:$0xff] }
 0x74a   : > { %1824 = vmatpush3.bf16.msra.mxu0 %v1925_v24 }
 0x810   : > { %v1341_v26 = vpop.f32.mrb[16].mxu0 }
 0x811   : > { %v1342_v27 = vadd.f32 %v1699_v25, %v1341_v26  ;;  %v1815_v28 = vpop.f32.mrb[17].mxu0 }
 0x812   : > { %v1344_v29 = vpop.f32.mrb[18].mxu0 }
 0x813   : > { %v1347_v30 = vmax.f32 %v1342_v27, 0.0  ;;  %v1816_v31 = vpop.f32.mrb[19].mxu0 }
 0x815   : > { %v1348_v32 = vpack.c.bf16 %v1347_v30, %v1347_v30 }
 0x817   : > { %1826 = vmatmul.mubr.msk.bf16.vlgmr.msra.gmra.mrb[20].mxu0 %vm1205_vm7, %v1348_v32 }
 0x8ea   : > { %v1425_v33 = vpop.f32.mrb[20].mxu0 }
 0x8eb   : > { %v1426_v34 = vadd.f32 %v1703_v8, %v1425_v33  ;;  %v1827_v35 = vpop.f32.mrb[21].mxu0 }
 0x8ec   : > { %v1428_v36 = vpop.f32.mrb[22].mxu0 }
 0x8ed   : > { %v1828_v37 = vpop.f32.mrb[23].mxu0  ;;  %v1431_v38 = vadd.f32 %v1426_v34, %v1279_v20 }
 0x8ef   : > { %v1434_v39 = vsel %vm660_vm1, %v1431_v38, 0.0 }
 0x8f0   : > { %1435 = vadd.xlane.f32.xlu0 %v1434_v39 }
 0x97d   : > { %v1436_v40 = vpop.xlane.xlu0 %1435 }
 0x97e   : > { %v1437_v41 = vmul.f32 0.03125, %v1436_v40 }
 0x980   : > { %v1438_v42 = vsub.f32 %v1431_v38, %v1437_v41 }
 0x982   : > { %v1439_v43 = vmul.f32 %v1438_v42, %v1438_v42 }
 0x984   : > { %v1440_v44 = vsel %vm660_vm1, %v1439_v43, 0.0 }
 0x985   : > { %1441 = vadd.xlane.f32.xlu1 %v1440_v44 }
 0xa12   : > { %v1442_v45 = vpop.xlane.xlu1 %1441 }
 0xa13   : > { %v1443_v46 = vmul.f32 0.03125, %v1442_v45 }
 0xa15   : > { %v1444_v47 = vadd.f32 1e-05, %v1443_v46 }
 0xa17   : > { %1944 = vrsqrt.f32 %v1444_v47 }
 0xa21   : > { %v1945_v48 = vpop.eup %1944 }
 0xa22   : > { %v1446_v50 = vmul.f32 %v1945_v48, %v1438_v42  ;;  %1465 = sbr.rel (%p1711_p1) target bundleno = 2601 (0xa29), region = 80 }
 0xa24   : > { %v1453_v52 = vmul.f32 %v1709_v49, %v1446_v50 }
 0xa26   : > { %v1460_v53 = vadd.f32 %v1710_v51, %v1453_v52 }
 0xa28   : > { %1461 = vst.msk [vmem:[#allocation2] sm:$0xff] %vm660_vm1, %v1460_v53  ;;  %1466 = vst.msk [vmem:[%s580_s7] sm:$0xff] (!%p1711_p1), %vm660_vm1, %v1460_v53 }
 0xa29 PF: > { %s2521_s13 = sld [smem:[#allocation10_spill]]  ;;  %s2522_s28 = sld [smem:[#allocation7_spill]] }
 0xa2a   : > { %s2524_s24 = sld [smem:[#allocation24_spill]]  ;;  %s1481_s21 = sshll.u32 %s580_s7, 4  ;;  %s1482_s21 = int_to_ptr.vmem [resolvable:$true] %s1481_s21 }
 0xa2b   : > { %s1946_s2 = scalar_lea.vmem %s1482_s21, 128  ;;  %s2052_s15 = smov [#allocation3]  }
 0xa2c   : > { %p1947_p2 = scmp.ne.s32.totalorder %s1482_s21, %s1946_s2  ;;  %s1950_s26 = sshll.u32 %s2052_s15, 4  ;;  %s1951_s26 = int_to_ptr.vmem [resolvable:$false] %s1950_s26 }
 0xa2d   : > { %s1952_s20 = scalar_lea.vmem %s1951_s26, 256  ;;  %p1953_p6 = scmp.lt.s32.totalorder %s1482_s21, %s1951_s26 }
 0xa2e   : > { %p1948_p4 = pnand %p1947_p2, %p2172_p3  ;;  %p1954_p7 = scmp.lt.s32.totalorder %s1952_s20, %s1946_s2 }
 0xa2f   : > { %s1713_s1 = sshll.u32 %s2521_s13, 7  ;;  %s2525_s16 = sand.u32 1, %s2522_s28  }
 0xa30   : > { %s2410_s14 = scalar_lea.hbm %s2524_s24, %s1713_s1  ;;  %s1468_s23 = scalar_lea.sflag [#allocation4], %s2525_s16 }
 0xa31   : > { %p1949_p5 = pneg %p1948_p4  ;;  %p1955_p8 = por %p1954_p7, %p1953_p6 }
 0xa33   : > { %p1956_p10 = pnand %p1955_p8, %p1949_p5 }
 0xa35   : > { %1959 = shalt.err (!%p1956_p10)
}
 0xa36   : > { %s1960_s7 = scalar_lea.hbm %s2410_s14, 128  ;;  %s1964_s3 = scalar_lea.hbm %s2524_s24, 256 }
 0xa37   : > { %p1961_p11 = scmp.ne.s32.totalorder %s2410_s14, %s1960_s7  ;;  %p1965_p0 = scmp.lt.u32.totalorder %s2410_s14, %s2524_s24 }
 0xa38   : > { %p1966_p1 = scmp.lt.u32.totalorder %s1964_s3, %s1960_s7  ;;  %p1968_p4 = scmp.lt.u32.totalorder %s1960_s7, %s2410_s14 }
 0xa39   : > { %p1962_p12 = pnand %p1961_p11, %p2172_p3 }
 0xa3a   : > { %p1967_p2 = por %p1966_p1, %p1965_p0 }
 0xa3b   : > { %p1963_p13 = pneg %p1962_p12 }
 0xa3c   : > { %p1969_p5 = por %p1968_p4, %p1967_p2 }
 0xa3e   : > { %p1970_p6 = pnand %p1969_p5, %p1963_p13 }
 0xa40   : > { %1973 = shalt.err (!%p1970_p6)
}
 0xa41   : > { %1829 = dma.vmem_to_hbm [thread:$0]  (%p2172_p3), %s1482_s21, 128, %s2410_s14, %s1468_s23  }
 0xa42 PF: > { %s2526_s18 = sld [smem:[#allocation13_spill]]  ;;  %s2527_s22 = sld [smem:[#allocation6_spill]] }
 0xa48   : > { %p1835_p7 = scmp.ge.s32.totalorder %s2526_s18, 2  ;;  %s1493_s28 = sand.u32 1, %s2527_s22  }
 0xa49   : > { %s1494_s1 = scalar_lea.sflag [#allocation4], %s1493_s28 }
 0xa4a   : > { %p1832_p8 = pnand %p1835_p7, %p2182_p9 }
 0xa4c   : > { %2007 = dma.done.wait (!%p1832_p8), %s1494_s1, 128  }
 0xa4d   : > { %2009 = vsyncadd (!%p1832_p8), %s1494_s1, 4294967168  ;;  %s26_s15 = sadd.s32 1, %s2526_s18   ;;  %s2529_s25 = sld [smem:[#allocation7_spill]] }
 0xa4e   : > { %p23_p10 = scmp.ge.s32.totalorder %s26_s15, 6   ;;  %s2530_s26 = sld [smem:[#allocation8_spill]] }
 0xa4f   : > { %s2531_s27 = sld [smem:[#allocation18_spill]]  ;;  %s2532_s28 = sld [smem:[#allocation11_spill]] }
 0xa50   : > { %s2533_s29 = sld [smem:[#allocation12_spill]]  ;;  %s2534_s30 = sld [smem:[#allocation14_spill]] }
 0xa51   : > { %s2535_s14 = sld [smem:[#allocation16_spill]]  ;;  %25 = sbr.rel (!%p23_p10) target bundleno = 12 (0xc), region = 148 }
 0xa58   :  { %1499 = vsyncpa [#allocation4], 1 }
 0xa59   :  { %1501 = vsyncpa [#allocation4 + $0x1], 1 }

</bundles_post_ra>
